<compile_context>
chip_gen: v6e
topology: v6e:2x2x1
jax: 0.10.0
libtpu: 0.0.40
codegen_flags: <defaults>
</compile_context>

<pallas_src>
import functools

import jax
import jax.numpy as jnp
from jax.experimental import pallas as pl
from jax.experimental.pallas import tpu as pltpu

ALPHA = 0.5
BETA = 0.5

_LANE = 128
_MAX_TILE_ROWS = 1024  # (1024, 128) f32 = 512 KiB per input block


def _tversky_sums_kernel(x_ref, t_ref, out_ref, acc_st, acc_s, acc_t):
    i = pl.program_id(0)

    @pl.when(i == 0)
    def _init():
        acc_st[...] = jnp.zeros_like(acc_st)
        acc_s[...] = jnp.zeros_like(acc_s)
        acc_t[...] = jnp.zeros_like(acc_t)
        out_ref[0] = 0.0
        out_ref[1] = 0.0
        out_ref[2] = 0.0

    x = x_ref[...].astype(jnp.float32)
    t = t_ref[...].astype(jnp.float32)
    s = jax.nn.sigmoid(x)

    # Steady state: elementwise accumulation only (no per-step cross-lane
    # reduce, no per-step SMEM scalar round trip).
    acc_st[...] = acc_st[...] + s * t
    acc_s[...] = acc_s[...] + s
    acc_t[...] = acc_t[...] + t

    @pl.when(i == pl.num_programs(0) - 1)
    def _finalize():
        out_ref[0] = jnp.sum(acc_st[...])
        out_ref[1] = jnp.sum(acc_s[...])
        out_ref[2] = jnp.sum(acc_t[...])


def _round_up(a, b):
    return -(-a // b) * b


def _tversky_sums(x_flat, t_flat):
    n = x_flat.shape[0]
    # Second-minor multiple required by the input dtype (f32: 8, bf16: 16,
    # int8/fp8: 32); tile rows stay a multiple of it.
    sub = {4: 8, 2: 16, 1: 32}.get(jnp.dtype(x_flat.dtype).itemsize, 8)

    rows = _round_up(pl.cdiv(n, _LANE), sub)
    tile_rows = min(_MAX_TILE_ROWS, rows)
    total_rows = _round_up(rows, tile_rows)
    pad = total_rows * _LANE - n

    if pad:
        # Pad logits with a large negative (sigmoid -> 0 exactly) and targets
        # with 0: padded elements contribute 0 to all three sums, so no mask
        # array is needed.
        xp = jnp.pad(x_flat, (0, pad), constant_values=-1e9)
        tp = jnp.pad(t_flat, (0, pad))
    else:
        xp, tp = x_flat, t_flat

    xp = xp.reshape(total_rows, _LANE)
    tp = tp.reshape(total_rows, _LANE)

    grid = (total_rows // tile_rows,)

    # TODO(synk): on v7x, split the reduction across the two TensorCores
    # (leading core-parallel grid axis + per-core partial outputs summed in
    # the JAX glue) for up to 2x; kept single-core here for portability.
    return pl.pallas_call(
        _tversky_sums_kernel,
        out_shape=jax.ShapeDtypeStruct((3,), jnp.float32),
        grid_spec=pltpu.PrefetchScalarGridSpec(
            num_scalar_prefetch=0,
            grid=grid,
            in_specs=[
                pl.BlockSpec((tile_rows, _LANE), lambda i: (i, 0)),
                pl.BlockSpec((tile_rows, _LANE), lambda i: (i, 0)),
            ],
            out_specs=pl.BlockSpec(memory_space=pltpu.SMEM),
            scratch_shapes=[
                pltpu.VMEM((tile_rows, _LANE), jnp.float32),
                pltpu.VMEM((tile_rows, _LANE), jnp.float32),
                pltpu.VMEM((tile_rows, _LANE), jnp.float32),
            ],
        ),
        compiler_params=pltpu.CompilerParams(
            dimension_semantics=("arbitrary",)),
    )(xp, tp)


@functools.partial(jax.jit, static_argnames=("smooth", "alpha", "beta"))
def tversky_loss(inputs, targets, smooth=1.0, alpha=ALPHA, beta=BETA):
    # Keep native dtypes; the kernel casts to f32 internally.
    x_flat = inputs.reshape(-1)
    t_flat = targets.reshape(-1)

    sums = _tversky_sums(x_flat, t_flat)
    sum_st, sum_s, sum_t = sums[0], sums[1], sums[2]

    TP = sum_st
    FP = sum_s - sum_st   # = sum((1 - t) * s)
    FN = sum_t - sum_st   # = sum(t * (1 - s))

    tversky = (TP + smooth) / (TP + alpha * FP + beta * FN + smooth)
    return 1.0 - tversky


def _reference(inputs, targets, smooth=1.0, alpha=ALPHA, beta=BETA):
    s = jax.nn.sigmoid(inputs.reshape(-1).astype(jnp.float32))
    t = targets.reshape(-1).astype(jnp.float32)
    TP = jnp.sum(s * t)
    FP = jnp.sum((1.0 - t) * s)
    FN = jnp.sum(t * (1.0 - s))
    return 1.0 - (TP + smooth) / (TP + alpha * FP + beta * FN + smooth)


if __name__ == "__main__":
    key = jax.random.PRNGKey(0)
    k1, k2 = jax.random.split(key)

    # Small shapes consistent with a segmentation-style module: NCHW logits
    # and binary targets.
    x = jax.random.normal(k1, (2, 4, 16, 16), dtype=jnp.float32)
    y = (jax.random.uniform(k2, (2, 4, 16, 16)) > 0.5).astype(jnp.float32)

    loss = tversky_loss(x, y)
    loss = jax.block_until_ready(loss)

    ref = _reference(x, y)
    assert jnp.allclose(loss, ref, rtol=1e-5, atol=1e-5), (loss, ref)

    print("KERNEL_OK")
</pallas_src>

<mosaic_0001>
module attributes {stable_mosaic.version = 11 : i64} {
  func.func @_tversky_sums_kernel(%arg0: i32, %arg1: memref<16x128xf32, #tpu.memory_space<vmem>>, %arg2: memref<16x128xf32, #tpu.memory_space<vmem>>, %arg3: memref<3xf32, #tpu.memory_space<smem>>, %arg4: memref<16x128xf32, #tpu.memory_space<vmem>>, %arg5: memref<16x128xf32, #tpu.memory_space<vmem>>, %arg6: memref<16x128xf32, #tpu.memory_space<vmem>>) attributes {dimension_semantics = [#tpu.dimension_semantics<arbitrary>], iteration_bounds = array<i64: 1>, scalar_prefetch = 0 : i64, scratch_operands = 3 : i64, tpu.core_type = #tpu.core_type<tc>, window_params = [{transform_indices = @transform_0, window_bounds = array<i64: 16, 128>}, {transform_indices = @transform_1, window_bounds = array<i64: 16, 128>}, {transform_indices = @transform_2, window_bounds = array<i64: 3>}]} {
    %c0_i32 = arith.constant 0 : i32
    %0 = arith.cmpi eq, %arg0, %c0_i32 : i32
    %1 = arith.extui %0 : i1 to i32
    %c0_i32_0 = arith.constant 0 : i32
    %2 = arith.cmpi ne, %1, %c0_i32_0 : i32
    scf.if %2 {
      %cst_18 = arith.constant 0.000000e+00 : f32
      %23 = vector.broadcast %cst_18 : f32 to vector<16x128xf32>
      %c0_19 = arith.constant 0 : index
      %c0_20 = arith.constant 0 : index
      %24 = vector.load %arg4[%c0_19, %c0_20] : memref<16x128xf32, #tpu.memory_space<vmem>>, vector<16x128xf32>
      tpu.vector_store %arg4[%c0_19, %c0_20], %23 {strides = array<i32>} : memref<16x128xf32, #tpu.memory_space<vmem>>, vector<16x128xf32>,
      %cst_21 = arith.constant 0.000000e+00 : f32
      %25 = vector.broadcast %cst_21 : f32 to vector<16x128xf32>
      %c0_22 = arith.constant 0 : index
      %c0_23 = arith.constant 0 : index
      %26 = vector.load %arg5[%c0_22, %c0_23] : memref<16x128xf32, #tpu.memory_space<vmem>>, vector<16x128xf32>
      tpu.vector_store %arg5[%c0_22, %c0_23], %25 {strides = array<i32>} : memref<16x128xf32, #tpu.memory_space<vmem>>, vector<16x128xf32>,
      %cst_24 = arith.constant 0.000000e+00 : f32
      %27 = vector.broadcast %cst_24 : f32 to vector<16x128xf32>
      %c0_25 = arith.constant 0 : index
      %c0_26 = arith.constant 0 : index
      %28 = vector.load %arg6[%c0_25, %c0_26] : memref<16x128xf32, #tpu.memory_space<vmem>>, vector<16x128xf32>
      tpu.vector_store %arg6[%c0_25, %c0_26], %27 {strides = array<i32>} : memref<16x128xf32, #tpu.memory_space<vmem>>, vector<16x128xf32>,
      %cst_27 = arith.constant 0.000000e+00 : f32
      %c0_28 = arith.constant 0 : index
      %29 = memref.load %arg3[%c0_28] : memref<3xf32, #tpu.memory_space<smem>>
      memref.store %cst_27, %arg3[%c0_28] : memref<3xf32, #tpu.memory_space<smem>>
      %cst_29 = arith.constant 0.000000e+00 : f32
      %c1 = arith.constant 1 : index
      %30 = memref.load %arg3[%c1] : memref<3xf32, #tpu.memory_space<smem>>
      memref.store %cst_29, %arg3[%c1] : memref<3xf32, #tpu.memory_space<smem>>
      %cst_30 = arith.constant 0.000000e+00 : f32
      %c2 = arith.constant 2 : index
      %31 = memref.load %arg3[%c2] : memref<3xf32, #tpu.memory_space<smem>>
      memref.store %cst_30, %arg3[%c2] : memref<3xf32, #tpu.memory_space<smem>>
    } else {
    }
    %c0 = arith.constant 0 : index
    %c0_1 = arith.constant 0 : index
    %3 = vector.load %arg1[%c0, %c0_1] : memref<16x128xf32, #tpu.memory_space<vmem>>, vector<16x128xf32>
    %c0_2 = arith.constant 0 : index
    %c0_3 = arith.constant 0 : index
    %4 = vector.load %arg2[%c0_2, %c0_3] : memref<16x128xf32, #tpu.memory_space<vmem>>, vector<16x128xf32>
    %5 = arith.negf %3 : vector<16x128xf32>
    %6 = math.exp %5 : vector<16x128xf32>
    %cst = arith.constant 1.000000e+00 : f32
    %7 = vector.broadcast %cst : f32 to vector<16x128xf32>
    %8 = arith.addf %7, %6 : vector<16x128xf32>
    %9 = arith.divf %7, %8 : vector<16x128xf32>
    %c0_4 = arith.constant 0 : index
    %c0_5 = arith.constant 0 : index
    %10 = vector.load %arg4[%c0_4, %c0_5] : memref<16x128xf32, #tpu.memory_space<vmem>>, vector<16x128xf32>
    %11 = arith.mulf %9, %4 : vector<16x128xf32>
    %12 = arith.addf %10, %11 : vector<16x128xf32>
    %c0_6 = arith.constant 0 : index
    %c0_7 = arith.constant 0 : index
    %13 = vector.load %arg4[%c0_6, %c0_7] : memref<16x128xf32, #tpu.memory_space<vmem>>, vector<16x128xf32>
    tpu.vector_store %arg4[%c0_6, %c0_7], %12 {strides = array<i32>} : memref<16x128xf32, #tpu.memory_space<vmem>>, vector<16x128xf32>,
    %c0_8 = arith.constant 0 : index
    %c0_9 = arith.constant 0 : index
    %14 = vector.load %arg5[%c0_8, %c0_9] : memref<16x128xf32, #tpu.memory_space<vmem>>, vector<16x128xf32>
    %15 = arith.addf %14, %9 : vector<16x128xf32>
    %c0_10 = arith.constant 0 : index
    %c0_11 = arith.constant 0 : index
    %16 = vector.load %arg5[%c0_10, %c0_11] : memref<16x128xf32, #tpu.memory_space<vmem>>, vector<16x128xf32>
    tpu.vector_store %arg5[%c0_10, %c0_11], %15 {strides = array<i32>} : memref<16x128xf32, #tpu.memory_space<vmem>>, vector<16x128xf32>,
    %c0_12 = arith.constant 0 : index
    %c0_13 = arith.constant 0 : index
    %17 = vector.load %arg6[%c0_12, %c0_13] : memref<16x128xf32, #tpu.memory_space<vmem>>, vector<16x128xf32>
    %18 = arith.addf %17, %4 : vector<16x128xf32>
    %c0_14 = arith.constant 0 : index
    %c0_15 = arith.constant 0 : index
    %19 = vector.load %arg6[%c0_14, %c0_15] : memref<16x128xf32, #tpu.memory_space<vmem>>, vector<16x128xf32>
    tpu.vector_store %arg6[%c0_14, %c0_15], %18 {strides = array<i32>} : memref<16x128xf32, #tpu.memory_space<vmem>>, vector<16x128xf32>,
    %c0_i32_16 = arith.constant 0 : i32
    %20 = arith.cmpi eq, %arg0, %c0_i32_16 : i32
    %21 = arith.extui %20 : i1 to i32
    %c0_i32_17 = arith.constant 0 : i32
    %22 = arith.cmpi ne, %21, %c0_i32_17 : i32
    scf.if %22 {
      %c0_18 = arith.constant 0 : index
      %c0_19 = arith.constant 0 : index
      %23 = vector.load %arg4[%c0_18, %c0_19] : memref<16x128xf32, #tpu.memory_space<vmem>>, vector<16x128xf32>
      %24 = vector.shape_cast %23 : vector<16x128xf32> to vector<1x16x128xf32>
      %cst_20 = arith.constant dense<0.000000e+00> : vector<1xf32>
      %25 = vector.multi_reduction <add>, %24, %cst_20 [1, 2] : vector<1x16x128xf32> to vector<1xf32>
      %26 = vector.shape_cast %25 : vector<1xf32> to vector<1x1x1xf32>
      %27 = vector.extract %26[0, 0, 0] : f32 from vector<1x1x1xf32>
      %c0_21 = arith.constant 0 : index
      %28 = memref.load %arg3[%c0_21] : memref<3xf32, #tpu.memory_space<smem>>
      memref.store %27, %arg3[%c0_21] : memref<3xf32, #tpu.memory_space<smem>>
      %c0_22 = arith.constant 0 : index
      %c0_23 = arith.constant 0 : index
      %29 = vector.load %arg5[%c0_22, %c0_23] : memref<16x128xf32, #tpu.memory_space<vmem>>, vector<16x128xf32>
      %30 = vector.shape_cast %29 : vector<16x128xf32> to vector<1x16x128xf32>
      %cst_24 = arith.constant dense<0.000000e+00> : vector<1xf32>
      %31 = vector.multi_reduction <add>, %30, %cst_24 [1, 2] : vector<1x16x128xf32> to vector<1xf32>
      %32 = vector.shape_cast %31 : vector<1xf32> to vector<1x1x1xf32>
      %33 = vector.extract %32[0, 0, 0] : f32 from vector<1x1x1xf32>
      %c1 = arith.constant 1 : index
      %34 = memref.load %arg3[%c1] : memref<3xf32, #tpu.memory_space<smem>>
      memref.store %33, %arg3[%c1] : memref<3xf32, #tpu.memory_space<smem>>
      %c0_25 = arith.constant 0 : index
      %c0_26 = arith.constant 0 : index
      %35 = vector.load %arg6[%c0_25, %c0_26] : memref<16x128xf32, #tpu.memory_space<vmem>>, vector<16x128xf32>
      %36 = vector.shape_cast %35 : vector<16x128xf32> to vector<1x16x128xf32>
      %cst_27 = arith.constant dense<0.000000e+00> : vector<1xf32>
      %37 = vector.multi_reduction <add>, %36, %cst_27 [1, 2] : vector<1x16x128xf32> to vector<1xf32>
      %38 = vector.shape_cast %37 : vector<1xf32> to vector<1x1x1xf32>
      %39 = vector.extract %38[0, 0, 0] : f32 from vector<1x1x1xf32>
      %c2 = arith.constant 2 : index
      %40 = memref.load %arg3[%c2] : memref<3xf32, #tpu.memory_space<smem>>
      memref.store %39, %arg3[%c2] : memref<3xf32, #tpu.memory_space<smem>>
    } else {
    }
    return
  }
  func.func @transform_0(%arg0: i32) -> (i32, i32) {
    %c0_i32 = arith.constant 0 : i32
    %c0_i32_0 = arith.constant 0 : i32
    return %arg0, %c0_i32 : i32, i32
  }
  func.func @transform_1(%arg0: i32) -> (i32, i32) {
    %c0_i32 = arith.constant 0 : i32
    %c0_i32_0 = arith.constant 0 : i32
    return %arg0, %c0_i32 : i32, i32
  }
  func.func @transform_2(%arg0: i32) -> i32 {
    %c0_i32 = arith.constant 0 : i32
    %c0_i32_0 = arith.constant 0 : i32
    return %c0_i32 : i32
  }
}

</mosaic_0001>

<bundles_post_ra>
// kernel: tversky_loss.1
= control target key start
LH: loop header
LB: loop body
LE: loop exit
PB: predicated region body
PF: predicated region fallthrough
CT: control target
= control target key end

     0   :  { %s187_s0 = inlined_call_operand.vmem [shape: f32[16,128], index: 0, kind: input, shape index: {}]   ;;  %s188_s1 = inlined_call_operand.vmem [shape: f32[16,128], index: 1, kind: input, shape index: {}]   ;;  %s189_s2 = inlined_call_operand.vmem [shape: f32[3], index: 2, kind: output, shape index: {}]  }
   0x1   :  { %v30_v0 = vld [vmem:[%s188_s1] sm:$0xff]  ;;  %v31_v1 = vld [vmem:[%s188_s1 + $0x8] sm:$0xff] }
   0x2   :  { %v28_v2 = vld [vmem:[%s187_s0] sm:$0xff]  ;;  %v97_v3 = vadd.f32 %v31_v1, %v30_v0  ;;  %v29_v4 = vld [vmem:[%s187_s0 + $0x8] sm:$0xff] }
   0x3   :  { %v124_v5 = vmul.f32 -1.442695, %v28_v2 }
   0x4   :  { %7 = vsyncpa [#allocation6], 0  ;;  %v125_v6 = vmul.f32 -1.442695, %v29_v4  ;;  %98 = vadd.xlane.f32.xlu1 %v97_v3  ;;  %s115_s18 = sshll.u32 %s189_s2, 4  ;;  %s116_s18 = int_to_ptr.vmem [resolvable:$true] %s115_s18 }
   0x5   :  { %134 = vpow2.f32 %v124_v5  ;;  %s142_s21 = scalar_lea.vmem %s116_s18, 16  ;;  %p147_p1 = scmp.lt.s32.totalorder %s116_s18, %s116_s18 }
   0x6   :  { %136 = vpow2.f32 %v125_v6  ;;  %p143_p0 = scmp.ne.s32.totalorder %s116_s18, %s142_s21  ;;  %p148_p2 = scmp.lt.s32.totalorder %s142_s21, %s142_s21 }
   0x8   :  { %p149_p3 = por %p148_p2, %p147_p1 }
   0xa   :  { %p150_p4 = pnand %p149_p3, %p143_p0 }
  0x12   :  { %v135_v7 = vpop.eup %134 }
  0x13   :  { %v137_v8 = vpop.eup %136  ;;  %v38_v9 = vadd.f32 1.0, %v135_v7 }
  0x14   :  { %v39_v10 = vadd.f32 1.0, %v137_v8 }
  0x15   :  { %138 = vrcp.f32 %v38_v9 }
  0x16   :  { %140 = vrcp.f32 %v39_v10 }
  0x22   :  { %v139_v11 = vpop.eup %138 }
  0x23   :  { %v141_v12 = vpop.eup %140  ;;  %v46_v13 = vmul.f32 %v139_v11, %v30_v0 }
  0x24   :  { %v47_v14 = vmul.f32 %v141_v12, %v31_v1  ;;  %v83_v16 = vadd.f32 %v141_v12, %v139_v11 }
  0x26   :  { %v69_v15 = vadd.f32 %v47_v14, %v46_v13 }
  0x28   :  { %70 = vadd.xlane.f32.xlu0 %v69_v15 }
  0x2c   :  { %84 = vadd.xlane.f32.xlu0 %v83_v16 }
  0x8d   :  { %v99_v17 = vpop.xlane.xlu1 %98 }
  0x8e   :  { %v100_v18 = vrot.slane %v99_v17, 4 }
  0x90   :  { %v101_v19 = vadd.f32 %v100_v18, %v99_v17 }
  0x92   :  { %v102_v23 = vrot.slane %v101_v19, 2 }
  0x94   :  { %v103_v29 = vadd.f32 %v102_v23, %v101_v19 }
  0x96   :  { %v104_v34 = vrot.slane %v103_v29, 1 }
  0x98   :  { %v105_v37 = vadd.f32 %v104_v34, %v103_v29 }
  0xb1   :  { %v71_v20 = vpop.xlane.xlu0 %70 }
  0xb2   :  { %v72_v21 = vrot.slane %v71_v20, 4 }
  0xb4   :  { %v73_v22 = vadd.f32 %v72_v21, %v71_v20 }
  0xb5   :  { %v85_v24 = vpop.xlane.xlu0 %84 }
  0xb6   :  { %v74_v25 = vrot.slane %v73_v22, 2  ;;  %v86_v26 = vrot.slane %v85_v24, 4 }
  0xb8   :  { %v87_v27 = vadd.f32 %v86_v26, %v85_v24  ;;  %v75_v28 = vadd.f32 %v74_v25, %v73_v22 }
  0xba   :  { %v88_v30 = vrot.slane %v87_v27, 2  ;;  %v76_v31 = vrot.slane %v75_v28, 1 }
  0xbc   :  { %v89_v32 = vadd.f32 %v88_v30, %v87_v27  ;;  %v77_v33 = vadd.f32 %v76_v31, %v75_v28 }
  0xbe   :  { %126 = vpush %v77_v33  ;;  %v90_v35 = vrot.slane %v89_v32, 1 }
  0xc0   :  { %v91_v36 = vadd.f32 %v90_v35, %v89_v32 }
  0xc2   :  { %128 = vpush %v91_v36 }
  0xc3   :  { %130 = vpush %v105_v37 }
  0xef   :  { %s127_s0 = spop %126 }
  0xf0   :  { %80 = sst [smem:[#allocation5]] %s127_s0 }
  0xf3   :  { %s129_s19 = spop %128 }
  0xf4   :  { %94 = sst [smem:[#allocation5 + $0x1]] %s129_s19  ;;  %s131_s20 = spop %130 }
  0xf5   :  { %108 = sst [smem:[#allocation5 + $0x2]] %s131_s20 }
  0xf6   :  { %153 = shalt.err (!%p150_p4)
}
  0xf7   :  { %s156_s22 = smov [#allocation5]  }
  0xf8   :  { %118 = dma.smem_to_vmem %s156_s22, 16, %s116_s18, [#allocation6]  }
  0xf9   :  { %154 = dma.done.wait [#allocation6], 16  }
  0xfa   :  { %155 = vsyncadd [#allocation6], 4294967280 }
  0xfb   :  { %122 = sfence }
  0xfc   :  { %123 = vsyncpa [#allocation6], 1 }

</bundles_post_ra>
